<compile_context>
chip_gen: v6e
topology: v6e:2x2x1
jax: 0.10.0
libtpu: 0.0.40
codegen_flags: <defaults>
</compile_context>

<pallas_src>
import functools

import jax
import jax.numpy as jnp
from jax import lax
from jax.experimental import pallas as pl
from jax.experimental.pallas import tpu as pltpu

IN_FEAT = 7
LIN = 32
HIDDEN = 16


def _mbti_kernel(x_ref, w1_ref, b1_ref, wi_ref, wh_ref, bg_ref, bhn_ref,
                 w2_ref, b2_ref, out_ref, gi_scratch, *, seq, batch):
    # ---- input path, hoisted out of the recurrence (all timesteps at once) ----
    x = x_ref[...]                                                     # (S*B, 7)
    a = jnp.maximum(
        jnp.dot(x, w1_ref[...], preferred_element_type=jnp.float32) + b1_ref[...],
        0.0)                                                           # (S*B, 32)
    # input-gate projections for r|z|n, with b_ir+b_hr | b_iz+b_hz | b_in folded in
    gi_scratch[...] = (
        jnp.dot(a, wi_ref[...], preferred_element_type=jnp.float32) + bg_ref[...])

    # hoist loop-invariant loads out of the recurrence
    wh = wh_ref[...]                                                   # (16, 48)
    bhn = bhn_ref[...]                                                 # (1, 16)

    h0 = jnp.zeros((batch, HIDDEN), jnp.float32)                       # h_0 = 0

    def step(t, h):
        gi_t = gi_scratch[pl.ds(t * batch, batch), :]                  # (B, 48)
        hh = jnp.dot(h, wh, preferred_element_type=jnp.float32)        # (B, 48)
        r = jax.nn.sigmoid(gi_t[:, 0:HIDDEN] + hh[:, 0:HIDDEN])
        z = jax.nn.sigmoid(gi_t[:, HIDDEN:2 * HIDDEN] + hh[:, HIDDEN:2 * HIDDEN])
        n = jnp.tanh(gi_t[:, 2 * HIDDEN:3 * HIDDEN]
                     + r * (hh[:, 2 * HIDDEN:3 * HIDDEN] + bhn))
        return (1.0 - z) * n + z * h

    h_last = lax.fori_loop(0, seq, step, h0, unroll=True)

    # head: ReLU -> Linear(16, 1) -> Sigmoid on the LAST timestep only
    h_last = jnp.maximum(h_last, 0.0)                                  # (B, 16)
    logits = jnp.dot(h_last, w2_ref[...], preferred_element_type=jnp.float32) + b2_ref[...]
    out_ref[...] = jax.nn.sigmoid(logits)                              # (B, 1)


def pack_params(p):
    """Concatenate / fold parameters host-side into the kernel's 8 arrays."""
    wi = jnp.concatenate([p["w_ir"], p["w_iz"], p["w_in"]], axis=1)    # (32, 48)
    wh = jnp.concatenate([p["w_hr"], p["w_hz"], p["w_hn"]], axis=1)    # (16, 48)
    bg = jnp.concatenate([p["b_ir"] + p["b_hr"],
                          p["b_iz"] + p["b_hz"],
                          p["b_in"]], axis=1)                          # (1, 48)
    return dict(w1=p["w1"], b1=p["b1"], wi=wi, wh=wh, bg=bg,
                bhn=p["b_hn"], w2=p["w2"], b2=p["b2"])


def mbti_forward(x, params):
    """x: (seq, batch, 7) float32.  Returns (batch, 1) float32."""
    seq, batch, _ = x.shape
    pk = pack_params(params)
    x2d = x.reshape(seq * batch, IN_FEAT)

    vmem = pl.BlockSpec(memory_space=pltpu.MemorySpace.VMEM)
    args = (x2d, pk["w1"], pk["b1"], pk["wi"], pk["wh"], pk["bg"], pk["bhn"],
            pk["w2"], pk["b2"])

    return pl.pallas_call(
        functools.partial(_mbti_kernel, seq=seq, batch=batch),
        out_shape=jax.ShapeDtypeStruct((batch, 1), jnp.float32),
        in_specs=[vmem] * len(args),
        out_specs=vmem,
        scratch_shapes=[pltpu.VMEM((seq * batch, 3 * HIDDEN), jnp.float32)],
    )(*args)


def init_params(key):
    """Deterministic synthetic parameters; shapes follow the torch module.
    Weights are stored as (in_features, out_features) — the transpose of
    nn.Linear / nn.GRU weight matrices."""
    ks = jax.random.split(key, 12)
    u = lambda k, shape, bound: jax.random.uniform(
        k, shape, jnp.float32, minval=-bound, maxval=bound)

    b_lin = 1.0 / jnp.sqrt(IN_FEAT)
    b_gru = 1.0 / jnp.sqrt(HIDDEN)
    b_out = 1.0 / jnp.sqrt(HIDDEN)

    params = {
        # nn.Linear(7, 32)
        "w1": u(ks[0], (IN_FEAT, LIN), b_lin),
        "b1": u(ks[1], (1, LIN), b_lin),
        # nn.GRU(32, 16): weight_ih_l0 is (3*16, 32) in torch; split + transpose
        "w_ir": u(ks[2], (LIN, HIDDEN), b_gru),
        "w_iz": u(ks[3], (LIN, HIDDEN), b_gru),
        "w_in": u(ks[4], (LIN, HIDDEN), b_gru),
        "w_hr": u(ks[5], (HIDDEN, HIDDEN), b_gru),
        "w_hz": u(ks[6], (HIDDEN, HIDDEN), b_gru),
        "w_hn": u(ks[7], (HIDDEN, HIDDEN), b_gru),
        "b_ir": u(ks[8], (1, HIDDEN), b_gru),
        "b_iz": u(ks[8], (1, HIDDEN), b_gru) * 0.5,
        "b_in": u(ks[8], (1, HIDDEN), b_gru) * 0.25,
        "b_hr": u(ks[9], (1, HIDDEN), b_gru),
        "b_hz": u(ks[9], (1, HIDDEN), b_gru) * 0.5,
        "b_hn": u(ks[9], (1, HIDDEN), b_gru) * 0.25,
        # nn.Linear(16, 1)
        "w2": u(ks[10], (HIDDEN, 1), b_out),
        "b2": u(ks[11], (1, 1), b_out),
    }
    return params


def reference_forward(x, p):
    """Pure-JAX reference mirroring the torch forward, for verification."""
    seq, batch, _ = x.shape
    a = jnp.maximum(jnp.einsum("sbi,io->sbo", x, p["w1"]) + p["b1"], 0.0)   # (S,B,32)

    def cell(h, a_t):
        r = jax.nn.sigmoid(a_t @ p["w_ir"] + p["b_ir"] + h @ p["w_hr"] + p["b_hr"])
        z = jax.nn.sigmoid(a_t @ p["w_iz"] + p["b_iz"] + h @ p["w_hz"] + p["b_hz"])
        n = jnp.tanh(a_t @ p["w_in"] + p["b_in"] + r * (h @ p["w_hn"] + p["b_hn"]))
        h_new = (1.0 - z) * n + z * h
        return h_new, None

    h0 = jnp.zeros((batch, HIDDEN), jnp.float32)
    h_last, _ = lax.scan(cell, h0, a)
    h_last = jnp.maximum(h_last, 0.0)
    return jax.nn.sigmoid(h_last @ p["w2"] + p["b2"])


if __name__ == "__main__":
    key = jax.random.PRNGKey(0)
    k_x, k_p = jax.random.split(key)

    seq, batch = 8, 2
    x = jax.random.normal(k_x, (seq, batch, IN_FEAT), dtype=jnp.float32)
    params = init_params(k_p)

    out = mbti_forward(x, params)
    out = jax.block_until_ready(out)

    ref = reference_forward(x, params)
    assert out.shape == (batch, 1), out.shape
    assert jnp.allclose(out, ref, atol=1e-5, rtol=1e-5), (out, ref)

    print("KERNEL_OK")
</pallas_src>

<mosaic_0001>
module attributes {stable_mosaic.version = 11 : i64} {
  func.func @_mbti_kernel(%arg0: memref<16x7xf32, #tpu.memory_space<vmem>>, %arg1: memref<7x32xf32, #tpu.memory_space<vmem>>, %arg2: memref<1x32xf32, #tpu.memory_space<vmem>>, %arg3: memref<32x48xf32, #tpu.memory_space<vmem>>, %arg4: memref<16x48xf32, #tpu.memory_space<vmem>>, %arg5: memref<1x48xf32, #tpu.memory_space<vmem>>, %arg6: memref<1x16xf32, #tpu.memory_space<vmem>>, %arg7: memref<16x1xf32, #tpu.memory_space<vmem>>, %arg8: memref<1x1xf32, #tpu.memory_space<vmem>>, %arg9: memref<2x1xf32, #tpu.memory_space<vmem>>, %arg10: memref<16x48xf32, #tpu.memory_space<vmem>>) attributes {dimension_semantics = [], scalar_prefetch = 0 : i64, scratch_operands = 1 : i64, tpu.core_type = #tpu.core_type<tc>} {
    %c0 = arith.constant 0 : index
    %c0_0 = arith.constant 0 : index
    %0 = vector.load %arg0[%c0, %c0_0] : memref<16x7xf32, #tpu.memory_space<vmem>>, vector<16x7xf32>
    %c0_1 = arith.constant 0 : index
    %c0_2 = arith.constant 0 : index
    %1 = vector.load %arg1[%c0_1, %c0_2] : memref<7x32xf32, #tpu.memory_space<vmem>>, vector<7x32xf32>
    %cst = arith.constant dense<0.000000e+00> : vector<16x32xf32>
    %2 = tpu.matmul %0, %1, %cst {dimension_numbers = #tpu.dot_dimension_numbers<[1], [0], [0], [1], [0, 0, 1, 1], [], []>} : vector<16x7xf32>, vector<7x32xf32>, vector<16x32xf32> -> vector<16x32xf32>
    %c0_3 = arith.constant 0 : index
    %c0_4 = arith.constant 0 : index
    %3 = vector.load %arg2[%c0_3, %c0_4] : memref<1x32xf32, #tpu.memory_space<vmem>>, vector<1x32xf32>
    %4 = vector.broadcast %3 : vector<1x32xf32> to vector<16x32xf32>
    %5 = arith.addf %2, %4 : vector<16x32xf32>
    %cst_5 = arith.constant 0.000000e+00 : f32
    %6 = vector.broadcast %cst_5 : f32 to vector<16x32xf32>
    %7 = arith.maximumf %5, %6 : vector<16x32xf32>
    %c0_6 = arith.constant 0 : index
    %c0_7 = arith.constant 0 : index
    %8 = vector.load %arg3[%c0_6, %c0_7] : memref<32x48xf32, #tpu.memory_space<vmem>>, vector<32x48xf32>
    %cst_8 = arith.constant dense<0.000000e+00> : vector<16x48xf32>
    %9 = tpu.matmul %7, %8, %cst_8 {dimension_numbers = #tpu.dot_dimension_numbers<[1], [0], [0], [1], [0, 0, 1, 1], [], []>} : vector<16x32xf32>, vector<32x48xf32>, vector<16x48xf32> -> vector<16x48xf32>
    %c0_9 = arith.constant 0 : index
    %c0_10 = arith.constant 0 : index
    %10 = vector.load %arg5[%c0_9, %c0_10] : memref<1x48xf32, #tpu.memory_space<vmem>>, vector<1x48xf32>
    %11 = vector.broadcast %10 : vector<1x48xf32> to vector<16x48xf32>
    %12 = arith.addf %9, %11 : vector<16x48xf32>
    %c0_11 = arith.constant 0 : index
    %c0_12 = arith.constant 0 : index
    %13 = vector.load %arg10[%c0_11, %c0_12] : memref<16x48xf32, #tpu.memory_space<vmem>>, vector<16x48xf32>
    tpu.vector_store %arg10[%c0_11, %c0_12], %12 {strides = array<i32>} : memref<16x48xf32, #tpu.memory_space<vmem>>, vector<16x48xf32>,
    %c0_13 = arith.constant 0 : index
    %c0_14 = arith.constant 0 : index
    %14 = vector.load %arg4[%c0_13, %c0_14] : memref<16x48xf32, #tpu.memory_space<vmem>>, vector<16x48xf32>
    %c0_15 = arith.constant 0 : index
    %c0_16 = arith.constant 0 : index
    %15 = vector.load %arg6[%c0_15, %c0_16] : memref<1x16xf32, #tpu.memory_space<vmem>>, vector<1x16xf32>
    %cst_17 = arith.constant 0.000000e+00 : f32
    %16 = vector.broadcast %cst_17 : f32 to vector<2x16xf32>
    %c0_i32 = arith.constant 0 : i32
    %c2_i32 = arith.constant 2 : i32
    %17 = arith.muli %c0_i32, %c2_i32 : i32
    %18 = arith.index_cast %17 : i32 to index
    %c0_18 = arith.constant 0 : index
    %19 = vector.load %arg10[%18, %c0_18] : memref<16x48xf32, #tpu.memory_space<vmem>>, vector<2x48xf32>
    %cst_19 = arith.constant dense<0.000000e+00> : vector<2x48xf32>
    %20 = tpu.matmul %16, %14, %cst_19 {dimension_numbers = #tpu.dot_dimension_numbers<[1], [0], [0], [1], [0, 0, 1, 1], [], []>} : vector<2x16xf32>, vector<16x48xf32>, vector<2x48xf32> -> vector<2x48xf32>
    %21 = vector.extract_strided_slice %19 {offsets = [0, 0], sizes = [2, 16], strides = [1, 1]} : vector<2x48xf32> to vector<2x16xf32>
    %22 = vector.extract_strided_slice %20 {offsets = [0, 0], sizes = [2, 16], strides = [1, 1]} : vector<2x48xf32> to vector<2x16xf32>
    %23 = arith.addf %21, %22 : vector<2x16xf32>
    %24 = arith.negf %23 : vector<2x16xf32>
    %25 = math.exp %24 : vector<2x16xf32>
    %cst_20 = arith.constant 1.000000e+00 : f32
    %26 = vector.broadcast %cst_20 : f32 to vector<2x16xf32>
    %27 = arith.addf %26, %25 : vector<2x16xf32>
    %28 = arith.divf %26, %27 : vector<2x16xf32>
    %29 = vector.extract_strided_slice %19 {offsets = [0, 16], sizes = [2, 16], strides = [1, 1]} : vector<2x48xf32> to vector<2x16xf32>
    %30 = vector.extract_strided_slice %20 {offsets = [0, 16], sizes = [2, 16], strides = [1, 1]} : vector<2x48xf32> to vector<2x16xf32>
    %31 = arith.addf %29, %30 : vector<2x16xf32>
    %32 = arith.negf %31 : vector<2x16xf32>
    %33 = math.exp %32 : vector<2x16xf32>
    %cst_21 = arith.constant 1.000000e+00 : f32
    %34 = vector.broadcast %cst_21 : f32 to vector<2x16xf32>
    %35 = arith.addf %34, %33 : vector<2x16xf32>
    %36 = arith.divf %34, %35 : vector<2x16xf32>
    %37 = vector.extract_strided_slice %19 {offsets = [0, 32], sizes = [2, 16], strides = [1, 1]} : vector<2x48xf32> to vector<2x16xf32>
    %38 = vector.extract_strided_slice %20 {offsets = [0, 32], sizes = [2, 16], strides = [1, 1]} : vector<2x48xf32> to vector<2x16xf32>
    %39 = vector.broadcast %15 : vector<1x16xf32> to vector<2x16xf32>
    %40 = arith.addf %38, %39 : vector<2x16xf32>
    %41 = arith.mulf %28, %40 : vector<2x16xf32>
    %42 = arith.addf %37, %41 : vector<2x16xf32>
    %43 = math.tanh %42 : vector<2x16xf32>
    %cst_22 = arith.constant 1.000000e+00 : f32
    %44 = vector.broadcast %cst_22 : f32 to vector<2x16xf32>
    %45 = arith.subf %44, %36 : vector<2x16xf32>
    %46 = arith.mulf %45, %43 : vector<2x16xf32>
    %47 = arith.mulf %36, %16 : vector<2x16xf32>
    %48 = arith.addf %46, %47 : vector<2x16xf32>
    %c1_i32 = arith.constant 1 : i32
    %c2_i32_23 = arith.constant 2 : i32
    %49 = arith.muli %c1_i32, %c2_i32_23 : i32
    %50 = arith.index_cast %49 : i32 to index
    %c0_24 = arith.constant 0 : index
    %51 = vector.load %arg10[%50, %c0_24] : memref<16x48xf32, #tpu.memory_space<vmem>>, vector<2x48xf32>
    %cst_25 = arith.constant dense<0.000000e+00> : vector<2x48xf32>
    %52 = tpu.matmul %48, %14, %cst_25 {dimension_numbers = #tpu.dot_dimension_numbers<[1], [0], [0], [1], [0, 0, 1, 1], [], []>} : vector<2x16xf32>, vector<16x48xf32>, vector<2x48xf32> -> vector<2x48xf32>
    %53 = vector.extract_strided_slice %51 {offsets = [0, 0], sizes = [2, 16], strides = [1, 1]} : vector<2x48xf32> to vector<2x16xf32>
    %54 = vector.extract_strided_slice %52 {offsets = [0, 0], sizes = [2, 16], strides = [1, 1]} : vector<2x48xf32> to vector<2x16xf32>
    %55 = arith.addf %53, %54 : vector<2x16xf32>
    %56 = arith.negf %55 : vector<2x16xf32>
    %57 = math.exp %56 : vector<2x16xf32>
    %cst_26 = arith.constant 1.000000e+00 : f32
    %58 = vector.broadcast %cst_26 : f32 to vector<2x16xf32>
    %59 = arith.addf %58, %57 : vector<2x16xf32>
    %60 = arith.divf %58, %59 : vector<2x16xf32>
    %61 = vector.extract_strided_slice %51 {offsets = [0, 16], sizes = [2, 16], strides = [1, 1]} : vector<2x48xf32> to vector<2x16xf32>
    %62 = vector.extract_strided_slice %52 {offsets = [0, 16], sizes = [2, 16], strides = [1, 1]} : vector<2x48xf32> to vector<2x16xf32>
    %63 = arith.addf %61, %62 : vector<2x16xf32>
    %64 = arith.negf %63 : vector<2x16xf32>
    %65 = math.exp %64 : vector<2x16xf32>
    %cst_27 = arith.constant 1.000000e+00 : f32
    %66 = vector.broadcast %cst_27 : f32 to vector<2x16xf32>
    %67 = arith.addf %66, %65 : vector<2x16xf32>
    %68 = arith.divf %66, %67 : vector<2x16xf32>
    %69 = vector.extract_strided_slice %51 {offsets = [0, 32], sizes = [2, 16], strides = [1, 1]} : vector<2x48xf32> to vector<2x16xf32>
    %70 = vector.extract_strided_slice %52 {offsets = [0, 32], sizes = [2, 16], strides = [1, 1]} : vector<2x48xf32> to vector<2x16xf32>
    %71 = vector.broadcast %15 : vector<1x16xf32> to vector<2x16xf32>
    %72 = arith.addf %70, %71 : vector<2x16xf32>
    %73 = arith.mulf %60, %72 : vector<2x16xf32>
    %74 = arith.addf %69, %73 : vector<2x16xf32>
    %75 = math.tanh %74 : vector<2x16xf32>
    %cst_28 = arith.constant 1.000000e+00 : f32
    %76 = vector.broadcast %cst_28 : f32 to vector<2x16xf32>
    %77 = arith.subf %76, %68 : vector<2x16xf32>
    %78 = arith.mulf %77, %75 : vector<2x16xf32>
    %79 = arith.mulf %68, %48 : vector<2x16xf32>
    %80 = arith.addf %78, %79 : vector<2x16xf32>
    %c2_i32_29 = arith.constant 2 : i32
    %c2_i32_30 = arith.constant 2 : i32
    %81 = arith.muli %c2_i32_29, %c2_i32_30 : i32
    %82 = arith.index_cast %81 : i32 to index
    %c0_31 = arith.constant 0 : index
    %83 = vector.load %arg10[%82, %c0_31] : memref<16x48xf32, #tpu.memory_space<vmem>>, vector<2x48xf32>
    %cst_32 = arith.constant dense<0.000000e+00> : vector<2x48xf32>
    %84 = tpu.matmul %80, %14, %cst_32 {dimension_numbers = #tpu.dot_dimension_numbers<[1], [0], [0], [1], [0, 0, 1, 1], [], []>} : vector<2x16xf32>, vector<16x48xf32>, vector<2x48xf32> -> vector<2x48xf32>
    %85 = vector.extract_strided_slice %83 {offsets = [0, 0], sizes = [2, 16], strides = [1, 1]} : vector<2x48xf32> to vector<2x16xf32>
    %86 = vector.extract_strided_slice %84 {offsets = [0, 0], sizes = [2, 16], strides = [1, 1]} : vector<2x48xf32> to vector<2x16xf32>
    %87 = arith.addf %85, %86 : vector<2x16xf32>
    %88 = arith.negf %87 : vector<2x16xf32>
    %89 = math.exp %88 : vector<2x16xf32>
    %cst_33 = arith.constant 1.000000e+00 : f32
    %90 = vector.broadcast %cst_33 : f32 to vector<2x16xf32>
    %91 = arith.addf %90, %89 : vector<2x16xf32>
    %92 = arith.divf %90, %91 : vector<2x16xf32>
    %93 = vector.extract_strided_slice %83 {offsets = [0, 16], sizes = [2, 16], strides = [1, 1]} : vector<2x48xf32> to vector<2x16xf32>
    %94 = vector.extract_strided_slice %84 {offsets = [0, 16], sizes = [2, 16], strides = [1, 1]} : vector<2x48xf32> to vector<2x16xf32>
    %95 = arith.addf %93, %94 : vector<2x16xf32>
    %96 = arith.negf %95 : vector<2x16xf32>
    %97 = math.exp %96 : vector<2x16xf32>
    %cst_34 = arith.constant 1.000000e+00 : f32
    %98 = vector.broadcast %cst_34 : f32 to vector<2x16xf32>
    %99 = arith.addf %98, %97 : vector<2x16xf32>
    %100 = arith.divf %98, %99 : vector<2x16xf32>
    %101 = vector.extract_strided_slice %83 {offsets = [0, 32], sizes = [2, 16], strides = [1, 1]} : vector<2x48xf32> to vector<2x16xf32>
    %102 = vector.extract_strided_slice %84 {offsets = [0, 32], sizes = [2, 16], strides = [1, 1]} : vector<2x48xf32> to vector<2x16xf32>
    %103 = vector.broadcast %15 : vector<1x16xf32> to vector<2x16xf32>
    %104 = arith.addf %102, %103 : vector<2x16xf32>
    %105 = arith.mulf %92, %104 : vector<2x16xf32>
    %106 = arith.addf %101, %105 : vector<2x16xf32>
    %107 = math.tanh %106 : vector<2x16xf32>
    %cst_35 = arith.constant 1.000000e+00 : f32
    %108 = vector.broadcast %cst_35 : f32 to vector<2x16xf32>
    %109 = arith.subf %108, %100 : vector<2x16xf32>
    %110 = arith.mulf %109, %107 : vector<2x16xf32>
    %111 = arith.mulf %100, %80 : vector<2x16xf32>
    %112 = arith.addf %110, %111 : vector<2x16xf32>
    %c3_i32 = arith.constant 3 : i32
    %c2_i32_36 = arith.constant 2 : i32
    %113 = arith.muli %c3_i32, %c2_i32_36 : i32
    %114 = arith.index_cast %113 : i32 to index
    %c0_37 = arith.constant 0 : index
    %115 = vector.load %arg10[%114, %c0_37] : memref<16x48xf32, #tpu.memory_space<vmem>>, vector<2x48xf32>
    %cst_38 = arith.constant dense<0.000000e+00> : vector<2x48xf32>
    %116 = tpu.matmul %112, %14, %cst_38 {dimension_numbers = #tpu.dot_dimension_numbers<[1], [0], [0], [1], [0, 0, 1, 1], [], []>} : vector<2x16xf32>, vector<16x48xf32>, vector<2x48xf32> -> vector<2x48xf32>
    %117 = vector.extract_strided_slice %115 {offsets = [0, 0], sizes = [2, 16], strides = [1, 1]} : vector<2x48xf32> to vector<2x16xf32>
    %118 = vector.extract_strided_slice %116 {offsets = [0, 0], sizes = [2, 16], strides = [1, 1]} : vector<2x48xf32> to vector<2x16xf32>
    %119 = arith.addf %117, %118 : vector<2x16xf32>
    %120 = arith.negf %119 : vector<2x16xf32>
    %121 = math.exp %120 : vector<2x16xf32>
    %cst_39 = arith.constant 1.000000e+00 : f32
    %122 = vector.broadcast %cst_39 : f32 to vector<2x16xf32>
    %123 = arith.addf %122, %121 : vector<2x16xf32>
    %124 = arith.divf %122, %123 : vector<2x16xf32>
    %125 = vector.extract_strided_slice %115 {offsets = [0, 16], sizes = [2, 16], strides = [1, 1]} : vector<2x48xf32> to vector<2x16xf32>
    %126 = vector.extract_strided_slice %116 {offsets = [0, 16], sizes = [2, 16], strides = [1, 1]} : vector<2x48xf32> to vector<2x16xf32>
    %127 = arith.addf %125, %126 : vector<2x16xf32>
    %128 = arith.negf %127 : vector<2x16xf32>
    %129 = math.exp %128 : vector<2x16xf32>
    %cst_40 = arith.constant 1.000000e+00 : f32
    %130 = vector.broadcast %cst_40 : f32 to vector<2x16xf32>
    %131 = arith.addf %130, %129 : vector<2x16xf32>
    %132 = arith.divf %130, %131 : vector<2x16xf32>
    %133 = vector.extract_strided_slice %115 {offsets = [0, 32], sizes = [2, 16], strides = [1, 1]} : vector<2x48xf32> to vector<2x16xf32>
    %134 = vector.extract_strided_slice %116 {offsets = [0, 32], sizes = [2, 16], strides = [1, 1]} : vector<2x48xf32> to vector<2x16xf32>
    %135 = vector.broadcast %15 : vector<1x16xf32> to vector<2x16xf32>
    %136 = arith.addf %134, %135 : vector<2x16xf32>
    %137 = arith.mulf %124, %136 : vector<2x16xf32>
    %138 = arith.addf %133, %137 : vector<2x16xf32>
    %139 = math.tanh %138 : vector<2x16xf32>
    %cst_41 = arith.constant 1.000000e+00 : f32
    %140 = vector.broadcast %cst_41 : f32 to vector<2x16xf32>
    %141 = arith.subf %140, %132 : vector<2x16xf32>
    %142 = arith.mulf %141, %139 : vector<2x16xf32>
    %143 = arith.mulf %132, %112 : vector<2x16xf32>
    %144 = arith.addf %142, %143 : vector<2x16xf32>
    %c4_i32 = arith.constant 4 : i32
    %c2_i32_42 = arith.constant 2 : i32
    %145 = arith.muli %c4_i32, %c2_i32_42 : i32
    %146 = arith.index_cast %145 : i32 to index
    %c0_43 = arith.constant 0 : index
    %147 = vector.load %arg10[%146, %c0_43] : memref<16x48xf32, #tpu.memory_space<vmem>>, vector<2x48xf32>
    %cst_44 = arith.constant dense<0.000000e+00> : vector<2x48xf32>
    %148 = tpu.matmul %144, %14, %cst_44 {dimension_numbers = #tpu.dot_dimension_numbers<[1], [0], [0], [1], [0, 0, 1, 1], [], []>} : vector<2x16xf32>, vector<16x48xf32>, vector<2x48xf32> -> vector<2x48xf32>
    %149 = vector.extract_strided_slice %147 {offsets = [0, 0], sizes = [2, 16], strides = [1, 1]} : vector<2x48xf32> to vector<2x16xf32>
    %150 = vector.extract_strided_slice %148 {offsets = [0, 0], sizes = [2, 16], strides = [1, 1]} : vector<2x48xf32> to vector<2x16xf32>
    %151 = arith.addf %149, %150 : vector<2x16xf32>
    %152 = arith.negf %151 : vector<2x16xf32>
    %153 = math.exp %152 : vector<2x16xf32>
    %cst_45 = arith.constant 1.000000e+00 : f32
    %154 = vector.broadcast %cst_45 : f32 to vector<2x16xf32>
    %155 = arith.addf %154, %153 : vector<2x16xf32>
    %156 = arith.divf %154, %155 : vector<2x16xf32>
    %157 = vector.extract_strided_slice %147 {offsets = [0, 16], sizes = [2, 16], strides = [1, 1]} : vector<2x48xf32> to vector<2x16xf32>
    %158 = vector.extract_strided_slice %148 {offsets = [0, 16], sizes = [2, 16], strides = [1, 1]} : vector<2x48xf32> to vector<2x16xf32>
    %159 = arith.addf %157, %158 : vector<2x16xf32>
    %160 = arith.negf %159 : vector<2x16xf32>
    %161 = math.exp %160 : vector<2x16xf32>
    %cst_46 = arith.constant 1.000000e+00 : f32
    %162 = vector.broadcast %cst_46 : f32 to vector<2x16xf32>
    %163 = arith.addf %162, %161 : vector<2x16xf32>
    %164 = arith.divf %162, %163 : vector<2x16xf32>
    %165 = vector.extract_strided_slice %147 {offsets = [0, 32], sizes = [2, 16], strides = [1, 1]} : vector<2x48xf32> to vector<2x16xf32>
    %166 = vector.extract_strided_slice %148 {offsets = [0, 32], sizes = [2, 16], strides = [1, 1]} : vector<2x48xf32> to vector<2x16xf32>
    %167 = vector.broadcast %15 : vector<1x16xf32> to vector<2x16xf32>
    %168 = arith.addf %166, %167 : vector<2x16xf32>
    %169 = arith.mulf %156, %168 : vector<2x16xf32>
    %170 = arith.addf %165, %169 : vector<2x16xf32>
    %171 = math.tanh %170 : vector<2x16xf32>
    %cst_47 = arith.constant 1.000000e+00 : f32
    %172 = vector.broadcast %cst_47 : f32 to vector<2x16xf32>
    %173 = arith.subf %172, %164 : vector<2x16xf32>
    %174 = arith.mulf %173, %171 : vector<2x16xf32>
    %175 = arith.mulf %164, %144 : vector<2x16xf32>
    %176 = arith.addf %174, %175 : vector<2x16xf32>
    %c5_i32 = arith.constant 5 : i32
    %c2_i32_48 = arith.constant 2 : i32
    %177 = arith.muli %c5_i32, %c2_i32_48 : i32
    %178 = arith.index_cast %177 : i32 to index
    %c0_49 = arith.constant 0 : index
    %179 = vector.load %arg10[%178, %c0_49] : memref<16x48xf32, #tpu.memory_space<vmem>>, vector<2x48xf32>
    %cst_50 = arith.constant dense<0.000000e+00> : vector<2x48xf32>
    %180 = tpu.matmul %176, %14, %cst_50 {dimension_numbers = #tpu.dot_dimension_numbers<[1], [0], [0], [1], [0, 0, 1, 1], [], []>} : vector<2x16xf32>, vector<16x48xf32>, vector<2x48xf32> -> vector<2x48xf32>
    %181 = vector.extract_strided_slice %179 {offsets = [0, 0], sizes = [2, 16], strides = [1, 1]} : vector<2x48xf32> to vector<2x16xf32>
    %182 = vector.extract_strided_slice %180 {offsets = [0, 0], sizes = [2, 16], strides = [1, 1]} : vector<2x48xf32> to vector<2x16xf32>
    %183 = arith.addf %181, %182 : vector<2x16xf32>
    %184 = arith.negf %183 : vector<2x16xf32>
    %185 = math.exp %184 : vector<2x16xf32>
    %cst_51 = arith.constant 1.000000e+00 : f32
    %186 = vector.broadcast %cst_51 : f32 to vector<2x16xf32>
    %187 = arith.addf %186, %185 : vector<2x16xf32>
    %188 = arith.divf %186, %187 : vector<2x16xf32>
    %189 = vector.extract_strided_slice %179 {offsets = [0, 16], sizes = [2, 16], strides = [1, 1]} : vector<2x48xf32> to vector<2x16xf32>
    %190 = vector.extract_strided_slice %180 {offsets = [0, 16], sizes = [2, 16], strides = [1, 1]} : vector<2x48xf32> to vector<2x16xf32>
    %191 = arith.addf %189, %190 : vector<2x16xf32>
    %192 = arith.negf %191 : vector<2x16xf32>
    %193 = math.exp %192 : vector<2x16xf32>
    %cst_52 = arith.constant 1.000000e+00 : f32
    %194 = vector.broadcast %cst_52 : f32 to vector<2x16xf32>
    %195 = arith.addf %194, %193 : vector<2x16xf32>
    %196 = arith.divf %194, %195 : vector<2x16xf32>
    %197 = vector.extract_strided_slice %179 {offsets = [0, 32], sizes = [2, 16], strides = [1, 1]} : vector<2x48xf32> to vector<2x16xf32>
    %198 = vector.extract_strided_slice %180 {offsets = [0, 32], sizes = [2, 16], strides = [1, 1]} : vector<2x48xf32> to vector<2x16xf32>
    %199 = vector.broadcast %15 : vector<1x16xf32> to vector<2x16xf32>
    %200 = arith.addf %198, %199 : vector<2x16xf32>
    %201 = arith.mulf %188, %200 : vector<2x16xf32>
    %202 = arith.addf %197, %201 : vector<2x16xf32>
    %203 = math.tanh %202 : vector<2x16xf32>
    %cst_53 = arith.constant 1.000000e+00 : f32
    %204 = vector.broadcast %cst_53 : f32 to vector<2x16xf32>
    %205 = arith.subf %204, %196 : vector<2x16xf32>
    %206 = arith.mulf %205, %203 : vector<2x16xf32>
    %207 = arith.mulf %196, %176 : vector<2x16xf32>
    %208 = arith.addf %206, %207 : vector<2x16xf32>
    %c6_i32 = arith.constant 6 : i32
    %c2_i32_54 = arith.constant 2 : i32
    %209 = arith.muli %c6_i32, %c2_i32_54 : i32
    %210 = arith.index_cast %209 : i32 to index
    %c0_55 = arith.constant 0 : index
    %211 = vector.load %arg10[%210, %c0_55] : memref<16x48xf32, #tpu.memory_space<vmem>>, vector<2x48xf32>
    %cst_56 = arith.constant dense<0.000000e+00> : vector<2x48xf32>
    %212 = tpu.matmul %208, %14, %cst_56 {dimension_numbers = #tpu.dot_dimension_numbers<[1], [0], [0], [1], [0, 0, 1, 1], [], []>} : vector<2x16xf32>, vector<16x48xf32>, vector<2x48xf32> -> vector<2x48xf32>
    %213 = vector.extract_strided_slice %211 {offsets = [0, 0], sizes = [2, 16], strides = [1, 1]} : vector<2x48xf32> to vector<2x16xf32>
    %214 = vector.extract_strided_slice %212 {offsets = [0, 0], sizes = [2, 16], strides = [1, 1]} : vector<2x48xf32> to vector<2x16xf32>
    %215 = arith.addf %213, %214 : vector<2x16xf32>
    %216 = arith.negf %215 : vector<2x16xf32>
    %217 = math.exp %216 : vector<2x16xf32>
    %cst_57 = arith.constant 1.000000e+00 : f32
    %218 = vector.broadcast %cst_57 : f32 to vector<2x16xf32>
    %219 = arith.addf %218, %217 : vector<2x16xf32>
    %220 = arith.divf %218, %219 : vector<2x16xf32>
    %221 = vector.extract_strided_slice %211 {offsets = [0, 16], sizes = [2, 16], strides = [1, 1]} : vector<2x48xf32> to vector<2x16xf32>
    %222 = vector.extract_strided_slice %212 {offsets = [0, 16], sizes = [2, 16], strides = [1, 1]} : vector<2x48xf32> to vector<2x16xf32>
    %223 = arith.addf %221, %222 : vector<2x16xf32>
    %224 = arith.negf %223 : vector<2x16xf32>
    %225 = math.exp %224 : vector<2x16xf32>
    %cst_58 = arith.constant 1.000000e+00 : f32
    %226 = vector.broadcast %cst_58 : f32 to vector<2x16xf32>
    %227 = arith.addf %226, %225 : vector<2x16xf32>
    %228 = arith.divf %226, %227 : vector<2x16xf32>
    %229 = vector.extract_strided_slice %211 {offsets = [0, 32], sizes = [2, 16], strides = [1, 1]} : vector<2x48xf32> to vector<2x16xf32>
    %230 = vector.extract_strided_slice %212 {offsets = [0, 32], sizes = [2, 16], strides = [1, 1]} : vector<2x48xf32> to vector<2x16xf32>
    %231 = vector.broadcast %15 : vector<1x16xf32> to vector<2x16xf32>
    %232 = arith.addf %230, %231 : vector<2x16xf32>
    %233 = arith.mulf %220, %232 : vector<2x16xf32>
    %234 = arith.addf %229, %233 : vector<2x16xf32>
    %235 = math.tanh %234 : vector<2x16xf32>
    %cst_59 = arith.constant 1.000000e+00 : f32
    %236 = vector.broadcast %cst_59 : f32 to vector<2x16xf32>
    %237 = arith.subf %236, %228 : vector<2x16xf32>
    %238 = arith.mulf %237, %235 : vector<2x16xf32>
    %239 = arith.mulf %228, %208 : vector<2x16xf32>
    %240 = arith.addf %238, %239 : vector<2x16xf32>
    %c7_i32 = arith.constant 7 : i32
    %c2_i32_60 = arith.constant 2 : i32
    %241 = arith.muli %c7_i32, %c2_i32_60 : i32
    %242 = arith.index_cast %241 : i32 to index
    %c0_61 = arith.constant 0 : index
    %243 = vector.load %arg10[%242, %c0_61] : memref<16x48xf32, #tpu.memory_space<vmem>>, vector<2x48xf32>
    %cst_62 = arith.constant dense<0.000000e+00> : vector<2x48xf32>
    %244 = tpu.matmul %240, %14, %cst_62 {dimension_numbers = #tpu.dot_dimension_numbers<[1], [0], [0], [1], [0, 0, 1, 1], [], []>} : vector<2x16xf32>, vector<16x48xf32>, vector<2x48xf32> -> vector<2x48xf32>
    %245 = vector.extract_strided_slice %243 {offsets = [0, 0], sizes = [2, 16], strides = [1, 1]} : vector<2x48xf32> to vector<2x16xf32>
    %246 = vector.extract_strided_slice %244 {offsets = [0, 0], sizes = [2, 16], strides = [1, 1]} : vector<2x48xf32> to vector<2x16xf32>
    %247 = arith.addf %245, %246 : vector<2x16xf32>
    %248 = arith.negf %247 : vector<2x16xf32>
    %249 = math.exp %248 : vector<2x16xf32>
    %cst_63 = arith.constant 1.000000e+00 : f32
    %250 = vector.broadcast %cst_63 : f32 to vector<2x16xf32>
    %251 = arith.addf %250, %249 : vector<2x16xf32>
    %252 = arith.divf %250, %251 : vector<2x16xf32>
    %253 = vector.extract_strided_slice %243 {offsets = [0, 16], sizes = [2, 16], strides = [1, 1]} : vector<2x48xf32> to vector<2x16xf32>
    %254 = vector.extract_strided_slice %244 {offsets = [0, 16], sizes = [2, 16], strides = [1, 1]} : vector<2x48xf32> to vector<2x16xf32>
    %255 = arith.addf %253, %254 : vector<2x16xf32>
    %256 = arith.negf %255 : vector<2x16xf32>
    %257 = math.exp %256 : vector<2x16xf32>
    %cst_64 = arith.constant 1.000000e+00 : f32
    %258 = vector.broadcast %cst_64 : f32 to vector<2x16xf32>
    %259 = arith.addf %258, %257 : vector<2x16xf32>
    %260 = arith.divf %258, %259 : vector<2x16xf32>
    %261 = vector.extract_strided_slice %243 {offsets = [0, 32], sizes = [2, 16], strides = [1, 1]} : vector<2x48xf32> to vector<2x16xf32>
    %262 = vector.extract_strided_slice %244 {offsets = [0, 32], sizes = [2, 16], strides = [1, 1]} : vector<2x48xf32> to vector<2x16xf32>
    %263 = vector.broadcast %15 : vector<1x16xf32> to vector<2x16xf32>
    %264 = arith.addf %262, %263 : vector<2x16xf32>
    %265 = arith.mulf %252, %264 : vector<2x16xf32>
    %266 = arith.addf %261, %265 : vector<2x16xf32>
    %267 = math.tanh %266 : vector<2x16xf32>
    %cst_65 = arith.constant 1.000000e+00 : f32
    %268 = vector.broadcast %cst_65 : f32 to vector<2x16xf32>
    %269 = arith.subf %268, %260 : vector<2x16xf32>
    %270 = arith.mulf %269, %267 : vector<2x16xf32>
    %271 = arith.mulf %260, %240 : vector<2x16xf32>
    %272 = arith.addf %270, %271 : vector<2x16xf32>
    %c8_i32 = arith.constant 8 : i32
    %cst_66 = arith.constant 0.000000e+00 : f32
    %273 = vector.broadcast %cst_66 : f32 to vector<2x16xf32>
    %274 = arith.maximumf %272, %273 : vector<2x16xf32>
    %c0_67 = arith.constant 0 : index
    %c0_68 = arith.constant 0 : index
    %275 = vector.load %arg7[%c0_67, %c0_68] : memref<16x1xf32, #tpu.memory_space<vmem>>, vector<16x1xf32>
    %cst_69 = arith.constant dense<0.000000e+00> : vector<2x1xf32>
    %276 = tpu.matmul %274, %275, %cst_69 {dimension_numbers = #tpu.dot_dimension_numbers<[1], [0], [0], [1], [0, 0, 1, 1], [], []>} : vector<2x16xf32>, vector<16x1xf32>, vector<2x1xf32> -> vector<2x1xf32>
    %c0_70 = arith.constant 0 : index
    %c0_71 = arith.constant 0 : index
    %277 = vector.load %arg8[%c0_70, %c0_71] : memref<1x1xf32, #tpu.memory_space<vmem>>, vector<1x1xf32>
    %278 = vector.broadcast %277 : vector<1x1xf32> to vector<2x1xf32>
    %279 = arith.addf %276, %278 : vector<2x1xf32>
    %280 = arith.negf %279 : vector<2x1xf32>
    %281 = math.exp %280 : vector<2x1xf32>
    %cst_72 = arith.constant 1.000000e+00 : f32
    %282 = vector.broadcast %cst_72 : f32 to vector<2x1xf32>
    %283 = arith.addf %282, %281 : vector<2x1xf32>
    %284 = arith.divf %282, %283 : vector<2x1xf32>
    %c0_73 = arith.constant 0 : index
    %c0_74 = arith.constant 0 : index
    %285 = vector.load %arg9[%c0_73, %c0_74] : memref<2x1xf32, #tpu.memory_space<vmem>>, vector<2x1xf32>
    tpu.vector_store %arg9[%c0_73, %c0_74], %284 {strides = array<i32>} : memref<2x1xf32, #tpu.memory_space<vmem>>, vector<2x1xf32>,
    return
  }
}

</mosaic_0001>

<bundles_post_ra>
// kernel: tpu_custom_call.1
= control target key start
LH: loop header
LB: loop body
LE: loop exit
PB: predicated region body
PF: predicated region fallthrough
CT: control target
= control target key end

     0   :  { %s1642_s0 = inlined_call_operand.vmem [shape: f32[16,7], index: 0, kind: input, shape index: {}]   ;;  %s1643_s1 = inlined_call_operand.hbm [shape: f32[7,32], index: 1, kind: input, shape index: {}]   ;;  %s1644_s2 = inlined_call_operand.hbm [shape: f32[1,32], index: 2, kind: input, shape index: {}]   ;;  %s1645_s3 = inlined_call_operand.vmem [shape: f32[32,48], index: 3, kind: input, shape index: {}]   ;;  %s1646_s4 = inlined_call_operand.vmem [shape: f32[16,48], index: 4, kind: input, shape index: {}]   ;;  %s1647_s5 = inlined_call_operand.vmem [shape: f32[1,48], index: 5, kind: input, shape index: {}]   ;;  %s1648_s6 = inlined_call_operand.vmem [shape: f32[1,16], index: 6, kind: input, shape index: {}]   ;;  %s1649_s7 = inlined_call_operand.vmem [shape: f32[16,1], index: 7, kind: input, shape index: {}]   ;;  %s1650_s8 = inlined_call_operand.<no memory space> [shape: f32[1,1], index: 8, kind: input, shape index: {}]   ;;  %s1651_s9 = inlined_call_operand.vmem [shape: f32[2,1], index: 9, kind: output, shape index: {}]  }
   0x1   :  { %v14_v0 = vstv %s1650_s8 }
   0x2   :  { %15 = vst [vmem:[#allocation3] sm:$0x1] %v14_v0 }
   0x3   :  { %16 = vsyncpa [#allocation5], 0 }
   0x4   :  { %17 = vsyncpa [#allocation7], 0  ;;  %s1429_s11 = smov [#allocation4]   ;;  %s1430_s13 = smov [#allocation6]  }
   0x5   :  { %s26_s12 = sshll.u32 %s1429_s11, 4  ;;  %s36_s14 = sshll.u32 %s1430_s13, 4  ;;  %s27_s12 = int_to_ptr.vmem [resolvable:$true] %s26_s12  ;;  %s37_s14 = int_to_ptr.vmem [resolvable:$true] %s36_s14 }
   0x6   :  { %s1393_s15 = scalar_lea.vmem %s27_s12, 128  ;;  %p1398_p1 = scmp.lt.s32.totalorder %s27_s12, %s27_s12 }
   0x7   :  { %p1394_p0 = scmp.ne.s32.totalorder %s27_s12, %s1393_s15  ;;  %p1399_p2 = scmp.lt.s32.totalorder %s1393_s15, %s1393_s15 }
   0x9   :  { %p1400_p3 = por %p1399_p2, %p1398_p1 }
   0xb   :  { %p1401_p4 = pnand %p1400_p3, %p1394_p0 }
   0xd   :  { %1404 = shalt.err (!%p1401_p4)
}
   0xe   :  { %29 = dma.hbm_to_vmem [thread:$0]  %s1643_s1, 128, %s27_s12, [#allocation5]  }
   0xf   :  { %s1413_s8 = scalar_lea.vmem %s37_s14, 16  ;;  %s1417_s18 = scalar_lea.vmem %s37_s14, 32 }
  0x10   :  { %p1414_p5 = scmp.ne.s32.totalorder %s37_s14, %s1413_s8  ;;  %p1418_p6 = scmp.lt.s32.totalorder %s37_s14, %s37_s14 }
  0x11   :  { %p1419_p7 = scmp.lt.s32.totalorder %s1417_s18, %s1413_s8 }
  0x13   :  { %p1420_p8 = por %p1419_p7, %p1418_p6 }
  0x15   :  { %p1421_p9 = pnand %p1420_p8, %p1414_p5 }
  0x17   :  { %1424 = shalt.err (!%p1421_p9)
}
  0x18   :  { %39 = dma.hbm_to_vmem [thread:$0]  %s1644_s2, 16, %s37_s14, [#allocation7]  }
  0x19   :  { %1425 = dma.done.wait [#allocation5], 128  }
  0x1a   :  { %1426 = vsyncadd [#allocation5], 4294967168 }
  0x1b   :  { %1427 = dma.done.wait [#allocation7], 16  }
  0x1c   :  { %1428 = vsyncadd [#allocation7], 4294967280  ;;  %vm75_vm0 = vcmask 1046528   ;;  %vm68_vm1 = vcmask 56320   ;;  %v60_v1 = vld [vmem:[#allocation4] sm:$0x7f] }
  0x1d   :  { %v58_v2 = vld [vmem:[%s1642_s0] sm:$0xff]  ;;  %v59_v3 = vld [vmem:[%s1642_s0 + $0x8] sm:$0xff]  ;;  %1247 = vmatprep.subr.msk.mxu0 %vm75_vm0, %v60_v1  ;;  %v1431_v5 = vmov 0.0   ;;  %vm1432_vm2 = vmmov 0   ;;  %v159_v7 = vld [vmem:[%s1645_s3 + $0x18] sm:$0xff]  ;;  %s1433_s14 = smov 32  }
  0x1e   :  { %1249 = vmatprep.mubr.msk.f32.mxu0 %vm68_vm1, %v58_v2  ;;  %v1504_v4 = vld [vmem:[%s1646_s4 + $0x8] sm:$0xff]  ;;  %1248 = vmatpush3.msk.msra.mxu0 %vm75_vm0, %v60_v1  ;;  %v1510_v6 = vld [vmem:[%s1646_s4] sm:$0xff]  ;;  %v158_v8 = vld [vmem:[%s1645_s3 + $0x10] sm:$0xff]  ;;  %vm167_vm3 = vcmask 261120   ;;  %vm249_vm4 = vcmask 392192   ;;  %vm256_vm5 = vcmask 130048  }
  0x1f   :  { %1250 = vmatmul.mubr.msk.f32.vlgmr.msra.gmra.mxu0 %vm68_vm1, %v59_v3  ;;  %1263 = vmatprep.subr.mxu0 %v1431_v5  ;;  %v157_v9 = vld [vmem:[%s1645_s3 + $0x8] sm:$0xff]  ;;  %v156_v10 = vld [vmem:[%s1645_s3] sm:$0xff]  ;;  %v1185_v12 = vld [vmem:[#allocation6] ss:$0 sm:$0xff]  ;;  %s1434_s3 = smov 96   ;;  %vm1177_vm6 = vcmask 1024  }
  0x20   :  { %1264 = vmatpush3.msra.mxu0 %v1504_v4  ;;  %1267 = vmatprep.mubr.msk.f32.mxu0 %vm1432_vm2, %v1431_v5  ;;  %v1193_v11 = vld [vmem:[%s1648_s6] ss:$0 sm:$0xff] }
  0x21   :  { %1265 = vmatprep.subr.mxu0 %v1431_v5  ;;  %1252 = vmatprep.subr.mxu1 %v159_v7  ;;  %v1189_v23 = vld [vmem:[%s1647_s5] ss:$0 sm:$0xff]  ;;  %s1435_s5 = smov 112  }
  0x22   :  { %1266 = vmatpush3.msra.mxu0 %v1510_v6  ;;  %1253 = vmatpush3.msra.mxu1 %v159_v7 }
  0x23   :  { %1268 = vmatmul.mubr.f32.vlgmr.msra.gmra.mxu0 %v1431_v5  ;;  %1270 = vmatprep.subr.mxu0 %v1431_v5 }
  0x24   :  { %1271 = vmatpush3.msra.mxu0 %v1504_v4  ;;  %1274 = vmatprep.mubr.msk.f32.mxu0 %vm1432_vm2, %v1431_v5 }
  0x25   :  { %1272 = vmatprep.subr.mxu0 %v1431_v5  ;;  %1254 = vmatprep.subr.mxu1 %v158_v8 }
  0x26   :  { %1273 = vmatpush3.msra.mxu0 %v1510_v6  ;;  %1255 = vmatpush3.msra.mxu1 %v158_v8 }
  0x27   :  { %1284 = vmatprep.subr.mxu0 %v1431_v5  ;;  %1256 = vmatprep.subr.mxu1 %v157_v9 }
  0x28   :  { %1257 = vmatpush3.msra.mxu1 %v157_v9  ;;  %342 = vrot.lane.b32.xlu0 %v1193_v11, %s1433_s14 }
  0x29   :  { %1258 = vmatprep.subr.mxu1 %v156_v10 }
  0x2a   :  { %1259 = vmatpush3.msra.mxu1 %v156_v10 }
  0x2b   :  { %1277 = vmatprep.subr.mxu1 %v1431_v5 }
  0x9a   :  { %v1542_v16 = vpop.permute.xlu0 %342 }
  0xdf   :  { %v1251_v13 = vpop.f32.mrf.mxu0 }
  0xe0   :  { %v151_v14 = vadd.f32 %v1251_v13, %v1185_v12 }
  0xe1   :  { %v145_v15 = vpop.f32.mrf.mxu0 }
  0xe2   :  { %v146_v17 = vadd.f32 %v1185_v12, %v145_v15  ;;  %v155_v21 = vmax.f32 %v151_v14, 0.0 }
  0xe3   :  { %v326_v18 = vpop.f32.mrf.mxu0 }
  0xe4   :  { %v154_v19 = vmax.f32 %v146_v17, 0.0  ;;  %v345_v20 = vadd.f32 %v1542_v16, %v326_v18 }
  0xe5   :  { %v1269_v22 = vpop.f32.mrf.mxu0 }
  0xe6   :  { %1260 = vmatprep.mubr.msk.f32.mxu1 %vm167_vm3, %v154_v19  ;;  %347 = vrot.lane.b32.xlu0 %v345_v20, %s1434_s3 }
  0xe7   :  { %1261 = vmatmul.mubr.msk.f32.vlgmr.msra.gmra.mxu1 %vm167_vm3, %v155_v21 }
  0xe8   :  { %1278 = vmatpush3.msra.mxu1 %v1504_v4  ;;  %1281 = vmatprep.mubr.msk.f32.mxu1 %vm1432_vm2, %v1431_v5 }
  0xe9   :  { %1279 = vmatprep.subr.mxu1 %v1431_v5 }
  0xea   :  { %1280 = vmatpush3.msra.mxu1 %v1510_v6 }
  0xeb   :  { %1291 = vmatprep.subr.mxu1 %v1431_v5 }
 0x158   :  { %v348_v33 = vpop.permute.xlu0 %347 }
 0x1a7   :  { %v1262_v24 = vpop.f32.mrf.mxu1 }
 0x1a8   :  { %v246_v25 = vadd.f32 %v1262_v24, %v1189_v23 }
 0x1a9   :  { %v240_v26 = vpop.f32.mrf.mxu1 }
 0x1aa   :  { %251 = vst.msk [vmem:[#allocation2 + $0x8] sm:$0xff] %vm249_vm4, %v246_v25  ;;  %v241_v27 = vadd.f32 %v1189_v23, %v240_v26 }
 0x1ac   :  { %250 = vst.msk [vmem:[#allocation2] sm:$0xff] %vm249_vm4, %v241_v27 }
 0x1b3   :  { %v255_v28 = vld [vmem:[#allocation2] sm:$0x3]  ;;  %v365_v48 = vld [vmem:[#allocation2 + $0x2] sm:$0x3]  ;;  %v468_v7 = vld [vmem:[#allocation2 + $0x4] sm:$0x3] }
 0x1b4   :  { %v330_v29 = vadd.f32 %v326_v18, %v255_v28 }
 0x1b6   :  { %v1192_v30 = vmul.f32 -1.442695, %v330_v29 }
 0x1b8   :  { %1333 = vpow2.f32 %v1192_v30 }
 0x1c5   :  { %v1334_v31 = vpop.eup %1333 }
 0x1c6   :  { %v334_v32 = vadd.f32 1.0, %v1334_v31 }
 0x1c8   :  { %1335 = vrcp.f32 %v334_v32 }
 0x1d5   :  { %v1336_v34 = vpop.eup %1335 }
 0x1d6   :  { %v350_v35 = vmul.f32 %v1336_v34, %v348_v33  ;;  %v357_v39 = vsub.f32 1.0, %v1336_v34  ;;  %v363_v41 = vmul.f32 0.0, %v1336_v34 }
 0x1d8   :  { %352 = vrot.lane.b32.xlu1 %v350_v35, %s1433_s14 }
 0x24a   :  { %v353_v36 = vpop.permute.xlu1 %352 }
 0x24b   :  { %v355_v37 = vadd.f32 %v353_v36, %v255_v28  ;;  %v571_v28 = vld [vmem:[#allocation2 + $0x6] sm:$0x3] }
 0x24d   :  { %1337 = vtanh.f32 %v355_v37 }
 0x25a   :  { %v1338_v38 = vpop.eup %1337 }
 0x25b   :  { %359 = vrot.lane.b32.xlu1 %v1338_v38, %s1435_s5 }
 0x2cd   :  { %v360_v40 = vpop.permute.xlu1 %359 }
 0x2ce   :  { %v362_v42 = vmul.f32 %v360_v40, %v357_v39 }
 0x2d0   :  { %v364_v43 = vadd.f32 %v363_v41, %v362_v42 }
 0x2d2   :  { %367 = vrot.lane.b32.xlu0 %v364_v43, %s1435_s5 }
 0x344   :  { %v368_v44 = vpop.permute.xlu0 %367 }
 0x345   :  { %1275 = vmatmul.mubr.msk.f32.vlgmr.msra.gmra.mxu0 %vm256_vm5, %v368_v44 }
 0x346   :  { %1285 = vmatpush3.msra.mxu0 %v1504_v4  ;;  %1288 = vmatprep.mubr.msk.f32.mxu0 %vm1432_vm2, %v1431_v5 }
 0x347   :  { %1286 = vmatprep.subr.mxu0 %v1431_v5 }
 0x348   :  { %1287 = vmatpush3.msra.mxu0 %v1510_v6 }
 0x349   :  { %1298 = vmatprep.subr.mxu0 %v1431_v5 }
 0x405   :  { %v437_v45 = vpop.f32.mrf.mxu0 }
 0x406   :  { %v448_v46 = vadd.f32 %v437_v45, %v1542_v16  ;;  %v441_v49 = vadd.f32 %v437_v45, %v365_v48 }
 0x407   :  { %v1276_v47 = vpop.f32.mrf.mxu0 }
 0x408   :  { %450 = vrot.lane.b32.xlu1 %v448_v46, %s1434_s3  ;;  %v1195_v50 = vmul.f32 -1.442695, %v441_v49 }
 0x40a   :  { %1339 = vpow2.f32 %v1195_v50 }
 0x417   :  { %v1340_v51 = vpop.eup %1339 }
 0x418   :  { %v445_v52 = vadd.f32 1.0, %v1340_v51 }
 0x41a   :  { %1341 = vrcp.f32 %v445_v52 }
 0x427   :  { %v1342_v53 = vpop.eup %1341 }
 0x428   :  { %v460_v59 = vsub.f32 1.0, %v1342_v53  ;;  %v466_v61 = vmul.f32 %v1342_v53, %v364_v43 }
 0x47a   :  { %v451_v54 = vpop.permute.xlu1 %450 }
 0x47b   :  { %v453_v55 = vmul.f32 %v1342_v53, %v451_v54 }
 0x47d   :  { %455 = vrot.lane.b32.xlu0 %v453_v55, %s1433_s14 }
 0x4ef   :  { %v456_v56 = vpop.permute.xlu0 %455 }
 0x4f0   :  { %v458_v57 = vadd.f32 %v456_v56, %v365_v48  ;;  %v674_v48 = vld [vmem:[#allocation2 + $0x8] sm:$0x3] }
 0x4f2   :  { %1343 = vtanh.f32 %v458_v57 }
 0x4ff   :  { %v1344_v58 = vpop.eup %1343 }
 0x500   :  { %462 = vrot.lane.b32.xlu1 %v1344_v58, %s1435_s5 }
 0x572   :  { %v463_v60 = vpop.permute.xlu1 %462 }
 0x573   :  { %v465_v62 = vmul.f32 %v463_v60, %v460_v59 }
 0x575   :  { %v467_v63 = vadd.f32 %v466_v61, %v465_v62 }
 0x577   :  { %470 = vrot.lane.b32.xlu0 %v467_v63, %s1435_s5 }
 0x5e9   :  { %v471_v0 = vpop.permute.xlu0 %470 }
 0x5ea   :  { %1282 = vmatmul.mubr.msk.f32.vlgmr.msra.gmra.mxu1 %vm256_vm5, %v471_v0 }
 0x5eb   :  { %1292 = vmatpush3.msra.mxu1 %v1504_v4  ;;  %1295 = vmatprep.mubr.msk.f32.mxu1 %vm1432_vm2, %v1431_v5 }
 0x5ec   :  { %1293 = vmatprep.subr.mxu1 %v1431_v5 }
 0x5ed   :  { %1294 = vmatpush3.msra.mxu1 %v1510_v6 }
 0x5ee   :  { %1305 = vmatprep.subr.mxu1 %v1431_v5 }
 0x6aa   :  { %v540_v1 = vpop.f32.mrf.mxu1 }
 0x6ab   :  { %v551_v2 = vadd.f32 %v540_v1, %v1542_v16  ;;  %v544_v8 = vadd.f32 %v540_v1, %v468_v7 }
 0x6ac   :  { %v1283_v3 = vpop.f32.mrf.mxu1 }
 0x6ad   :  { %553 = vrot.lane.b32.xlu1 %v551_v2, %s1434_s3  ;;  %v1197_v9 = vmul.f32 -1.442695, %v544_v8 }
 0x6af   :  { %1345 = vpow2.f32 %v1197_v9 }
 0x6bc   :  { %v1346_v10 = vpop.eup %1345 }
 0x6bd   :  { %v548_v11 = vadd.f32 1.0, %v1346_v10 }
 0x6bf   :  { %1347 = vrcp.f32 %v548_v11 }
 0x6cc   :  { %v1348_v12 = vpop.eup %1347 }
 0x6cd   :  { %v563_v19 = vsub.f32 1.0, %v1348_v12  ;;  %v569_v21 = vmul.f32 %v1348_v12, %v467_v63 }
 0x71f   :  { %v554_v13 = vpop.permute.xlu1 %553 }
 0x720   :  { %v556_v14 = vmul.f32 %v1348_v12, %v554_v13 }
 0x722   :  { %558 = vrot.lane.b32.xlu0 %v556_v14, %s1433_s14 }
 0x794   :  { %v559_v15 = vpop.permute.xlu0 %558 }
 0x795   :  { %v561_v17 = vadd.f32 %v559_v15, %v468_v7  ;;  %v777_v7 = vld [vmem:[#allocation2 + $0xa] sm:$0x3] }
 0x797   :  { %1349 = vtanh.f32 %v561_v17 }
 0x7a4   :  { %v1350_v18 = vpop.eup %1349 }
 0x7a5   :  { %565 = vrot.lane.b32.xlu1 %v1350_v18, %s1435_s5 }
 0x817   :  { %v566_v20 = vpop.permute.xlu1 %565 }
 0x818   :  { %v568_v22 = vmul.f32 %v566_v20, %v563_v19 }
 0x81a   :  { %v570_v23 = vadd.f32 %v569_v21, %v568_v22 }
 0x81c   :  { %573 = vrot.lane.b32.xlu0 %v570_v23, %s1435_s5 }
 0x88e   :  { %v574_v24 = vpop.permute.xlu0 %573 }
 0x88f   :  { %1289 = vmatmul.mubr.msk.f32.vlgmr.msra.gmra.mxu0 %vm256_vm5, %v574_v24 }
 0x890   :  { %1299 = vmatpush3.msra.mxu0 %v1504_v4  ;;  %1302 = vmatprep.mubr.msk.f32.mxu0 %vm1432_vm2, %v1431_v5 }
 0x891   :  { %1300 = vmatprep.subr.mxu0 %v1431_v5 }
 0x892   :  { %1301 = vmatpush3.msra.mxu0 %v1510_v6 }
 0x893   :  { %1312 = vmatprep.subr.mxu0 %v1431_v5 }
 0x94f   :  { %v643_v25 = vpop.f32.mrf.mxu0 }
 0x950   :  { %v654_v26 = vadd.f32 %v643_v25, %v1542_v16  ;;  %v647_v29 = vadd.f32 %v643_v25, %v571_v28 }
 0x951   :  { %v1290_v27 = vpop.f32.mrf.mxu0 }
 0x952   :  { %656 = vrot.lane.b32.xlu1 %v654_v26, %s1434_s3  ;;  %v1199_v30 = vmul.f32 -1.442695, %v647_v29  ;;  %v880_v26 = vld [vmem:[#allocation2 + $0xc] sm:$0x3] }
 0x954   :  { %1351 = vpow2.f32 %v1199_v30 }
 0x961   :  { %v1352_v31 = vpop.eup %1351 }
 0x962   :  { %v651_v32 = vadd.f32 1.0, %v1352_v31 }
 0x964   :  { %1353 = vrcp.f32 %v651_v32 }
 0x971   :  { %v1354_v33 = vpop.eup %1353 }
 0x972   :  { %v666_v39 = vsub.f32 1.0, %v1354_v33  ;;  %v672_v41 = vmul.f32 %v1354_v33, %v570_v23 }
 0x9c4   :  { %v657_v34 = vpop.permute.xlu1 %656 }
 0x9c5   :  { %v659_v35 = vmul.f32 %v1354_v33, %v657_v34 }
 0x9c7   :  { %661 = vrot.lane.b32.xlu0 %v659_v35, %s1433_s14 }
 0xa39   :  { %v662_v36 = vpop.permute.xlu0 %661 }
 0xa3a   :  { %v664_v37 = vadd.f32 %v662_v36, %v571_v28 }
 0xa3c   :  { %1355 = vtanh.f32 %v664_v37 }
 0xa49   :  { %v1356_v38 = vpop.eup %1355 }
 0xa4a   :  { %668 = vrot.lane.b32.xlu1 %v1356_v38, %s1435_s5 }
 0xabc   :  { %v669_v40 = vpop.permute.xlu1 %668 }
 0xabd   :  { %v671_v42 = vmul.f32 %v669_v40, %v666_v39 }
 0xabf   :  { %v673_v43 = vadd.f32 %v672_v41, %v671_v42 }
 0xac1   :  { %676 = vrot.lane.b32.xlu0 %v673_v43, %s1435_s5 }
 0xb33   :  { %v677_v44 = vpop.permute.xlu0 %676 }
 0xb34   :  { %1296 = vmatmul.mubr.msk.f32.vlgmr.msra.gmra.mxu1 %vm256_vm5, %v677_v44 }
 0xb35   :  { %1306 = vmatpush3.msra.mxu1 %v1504_v4  ;;  %1309 = vmatprep.mubr.msk.f32.mxu1 %vm1432_vm2, %v1431_v5 }
 0xb36   :  { %1307 = vmatprep.subr.mxu1 %v1431_v5 }
 0xb37   :  { %1308 = vmatpush3.msra.mxu1 %v1510_v6 }
 0xb38   :  { %1319 = vmatprep.subr.mxu1 %v1431_v5 }
 0xbf4   :  { %v746_v45 = vpop.f32.mrf.mxu1 }
 0xbf5   :  { %v757_v46 = vadd.f32 %v746_v45, %v1542_v16  ;;  %v750_v49 = vadd.f32 %v746_v45, %v674_v48 }
 0xbf6   :  { %v1297_v47 = vpop.f32.mrf.mxu1 }
 0xbf7   :  { %759 = vrot.lane.b32.xlu1 %v757_v46, %s1434_s3  ;;  %v1201_v50 = vmul.f32 -1.442695, %v750_v49  ;;  %v983_v46 = vld [vmem:[#allocation2 + $0xe] sm:$0x3] }
 0xbf9   :  { %1357 = vpow2.f32 %v1201_v50 }
 0xc06   :  { %v1358_v51 = vpop.eup %1357 }
 0xc07   :  { %v754_v52 = vadd.f32 1.0, %v1358_v51 }
 0xc09   :  { %1359 = vrcp.f32 %v754_v52 }
 0xc16   :  { %v1360_v53 = vpop.eup %1359 }
 0xc17   :  { %v769_v59 = vsub.f32 1.0, %v1360_v53  ;;  %v775_v61 = vmul.f32 %v1360_v53, %v673_v43 }
 0xc69   :  { %v760_v54 = vpop.permute.xlu1 %759 }
 0xc6a   :  { %v762_v55 = vmul.f32 %v1360_v53, %v760_v54 }
 0xc6c   :  { %764 = vrot.lane.b32.xlu0 %v762_v55, %s1433_s14 }
 0xcde   :  { %v765_v56 = vpop.permute.xlu0 %764 }
 0xcdf   :  { %v767_v57 = vadd.f32 %v765_v56, %v674_v48  ;;  %v1087_v56 = vld [vmem:[%s1649_s7] sm:$0xff] }
 0xce1   :  { %1361 = vtanh.f32 %v767_v57 }
 0xcee   :  { %v1362_v58 = vpop.eup %1361 }
 0xcef   :  { %771 = vrot.lane.b32.xlu1 %v1362_v58, %s1435_s5 }
 0xd61   :  { %v772_v60 = vpop.permute.xlu1 %771 }
 0xd62   :  { %v774_v62 = vmul.f32 %v772_v60, %v769_v59 }
 0xd64   :  { %v776_v63 = vadd.f32 %v775_v61, %v774_v62 }
 0xd66   :  { %779 = vrot.lane.b32.xlu0 %v776_v63, %s1435_s5 }
 0xdd8   :  { %v780_v0 = vpop.permute.xlu0 %779 }
 0xdd9   :  { %1303 = vmatmul.mubr.msk.f32.vlgmr.msra.gmra.mxu0 %vm256_vm5, %v780_v0 }
 0xdda   :  { %1313 = vmatpush3.msra.mxu0 %v1504_v4  ;;  %1316 = vmatprep.mubr.msk.f32.mxu0 %vm1432_vm2, %v1431_v5 }
 0xddb   :  { %1314 = vmatprep.subr.mxu0 %v1431_v5 }
 0xddc   :  { %1315 = vmatpush3.msra.mxu0 %v1510_v6 }
 0xe99   :  { %v849_v1 = vpop.f32.mrf.mxu0 }
 0xe9a   :  { %v860_v2 = vadd.f32 %v849_v1, %v1542_v16  ;;  %v853_v8 = vadd.f32 %v849_v1, %v777_v7  ;;  %v1208_v1 = vld [vmem:[#allocation3] ss:$0 sm:$0xff] }
 0xe9b   :  { %v1304_v3 = vpop.f32.mrf.mxu0 }
 0xe9c   :  { %862 = vrot.lane.b32.xlu1 %v860_v2, %s1434_s3  ;;  %v1203_v9 = vmul.f32 -1.442695, %v853_v8 }
 0xe9e   :  { %1363 = vpow2.f32 %v1203_v9 }
 0xeab   :  { %v1364_v10 = vpop.eup %1363 }
 0xeac   :  { %v857_v11 = vadd.f32 1.0, %v1364_v10 }
 0xeae   :  { %1365 = vrcp.f32 %v857_v11 }
 0xebb   :  { %v1366_v4 = vpop.eup %1365 }
 0xebc   :  { %v872_v17 = vsub.f32 1.0, %v1366_v4  ;;  %v878_v19 = vmul.f32 %v1366_v4, %v776_v63 }
 0xf0e   :  { %v863_v12 = vpop.permute.xlu1 %862 }
 0xf0f   :  { %v865_v13 = vmul.f32 %v1366_v4, %v863_v12 }
 0xf11   :  { %867 = vrot.lane.b32.xlu0 %v865_v13, %s1433_s14 }
 0xf83   :  { %v868_v14 = vpop.permute.xlu0 %867 }
 0xf84   :  { %v870_v6 = vadd.f32 %v868_v14, %v777_v7 }
 0xf86   :  { %1367 = vtanh.f32 %v870_v6 }
 0xf93   :  { %v1368_v15 = vpop.eup %1367 }
 0xf94   :  { %874 = vrot.lane.b32.xlu1 %v1368_v15, %s1435_s5 }
0x1006   :  { %v875_v18 = vpop.permute.xlu1 %874 }
0x1007   :  { %v877_v20 = vmul.f32 %v875_v18, %v872_v17 }
0x1009   :  { %v879_v21 = vadd.f32 %v878_v19, %v877_v20 }
0x100b   :  { %882 = vrot.lane.b32.xlu0 %v879_v21, %s1435_s5 }
0x107d   :  { %v883_v22 = vpop.permute.xlu0 %882 }
0x107e   :  { %1310 = vmatmul.mubr.msk.f32.vlgmr.msra.gmra.mxu1 %vm256_vm5, %v883_v22 }
0x107f   :  { %1323 = vmatprep.mubr.msk.f32.mxu1 %vm1432_vm2, %v1431_v5 }
0x113e   :  { %v952_v23 = vpop.f32.mrf.mxu1 }
0x113f   :  { %v963_v24 = vadd.f32 %v952_v23, %v1542_v16  ;;  %v956_v27 = vadd.f32 %v952_v23, %v880_v26 }
0x1140   :  { %v1311_v25 = vpop.f32.mrf.mxu1 }
0x1141   :  { %965 = vrot.lane.b32.xlu1 %v963_v24, %s1434_s3  ;;  %v1205_v28 = vmul.f32 -1.442695, %v956_v27 }
0x1143   :  { %1369 = vpow2.f32 %v1205_v28 }
0x1150   :  { %v1370_v29 = vpop.eup %1369 }
0x1151   :  { %v960_v30 = vadd.f32 1.0, %v1370_v29 }
0x1153   :  { %1371 = vrcp.f32 %v960_v30 }
0x1160   :  { %v1372_v31 = vpop.eup %1371 }
0x1161   :  { %v975_v37 = vsub.f32 1.0, %v1372_v31  ;;  %v981_v39 = vmul.f32 %v1372_v31, %v879_v21 }
0x11b3   :  { %v966_v32 = vpop.permute.xlu1 %965 }
0x11b4   :  { %v968_v33 = vmul.f32 %v1372_v31, %v966_v32 }
0x11b6   :  { %970 = vrot.lane.b32.xlu0 %v968_v33, %s1433_s14 }
0x1228   :  { %v971_v34 = vpop.permute.xlu0 %970 }
0x1229   :  { %v973_v35 = vadd.f32 %v971_v34, %v880_v26 }
0x122b   :  { %1373 = vtanh.f32 %v973_v35 }
0x1238   :  { %v1374_v36 = vpop.eup %1373 }
0x1239   :  { %977 = vrot.lane.b32.xlu1 %v1374_v36, %s1435_s5 }
0x12ab   :  { %v978_v38 = vpop.permute.xlu1 %977 }
0x12ac   :  { %v980_v40 = vmul.f32 %v978_v38, %v975_v37 }
0x12ae   :  { %v982_v41 = vadd.f32 %v981_v39, %v980_v40 }
0x12b0   :  { %985 = vrot.lane.b32.xlu0 %v982_v41, %s1435_s5 }
0x1322   :  { %v986_v42 = vpop.permute.xlu0 %985 }
0x1323   :  { %1317 = vmatmul.mubr.msk.f32.vlgmr.msra.gmra.mxu0 %vm256_vm5, %v986_v42 }
0x13e3   :  { %v1055_v43 = vpop.f32.mrf.mxu0 }
0x13e4   :  { %v1066_v44 = vadd.f32 %v1055_v43, %v1542_v16  ;;  %v1059_v47 = vadd.f32 %v1055_v43, %v983_v46  ;;  %v1088_v16 = vld [vmem:[%s1649_s7 + $0x8] sm:$0xff] }
0x13e5   :  { %v1318_v45 = vpop.f32.mrf.mxu0  ;;  %1320 = vmatpush3.msra.mxu1 %v1088_v16 }
0x13e6   :  { %1068 = vrot.lane.b32.xlu1 %v1066_v44, %s1434_s3  ;;  %v1207_v48 = vmul.f32 -1.442695, %v1059_v47  ;;  %1321 = vmatprep.subr.mxu1 %v1431_v5 }
0x13e7   :  { %1322 = vmatpush3.msra.mxu1 %v1087_v56 }
0x13e8   :  { %1375 = vpow2.f32 %v1207_v48 }
0x13f5   :  { %v1376_v49 = vpop.eup %1375 }
0x13f6   :  { %v1063_v50 = vadd.f32 1.0, %v1376_v49 }
0x13f8   :  { %1377 = vrcp.f32 %v1063_v50 }
0x1405   :  { %v1378_v51 = vpop.eup %1377 }
0x1406   :  { %v1078_v58 = vsub.f32 1.0, %v1378_v51  ;;  %v1084_v60 = vmul.f32 %v1378_v51, %v982_v41 }
0x1458   :  { %v1069_v52 = vpop.permute.xlu1 %1068 }
0x1459   :  { %v1071_v53 = vmul.f32 %v1378_v51, %v1069_v52 }
0x145b   :  { %1073 = vrot.lane.b32.xlu0 %v1071_v53, %s1433_s14 }
0x14cd   :  { %v1074_v54 = vpop.permute.xlu0 %1073 }
0x14ce   :  { %v1076_v55 = vadd.f32 %v1074_v54, %v983_v46 }
0x14d0   :  { %1379 = vtanh.f32 %v1076_v55 }
0x14dd   :  { %v1380_v57 = vpop.eup %1379 }
0x14de   :  { %1080 = vrot.lane.b32.xlu1 %v1380_v57, %s1435_s5 }
0x1550   :  { %v1081_v59 = vpop.permute.xlu1 %1080 }
0x1551   :  { %v1083_v61 = vmul.f32 %v1081_v59, %v1078_v58 }
0x1553   :  { %v1085_v62 = vadd.f32 %v1084_v60, %v1083_v61 }
0x1555   :  { %v1086_v63 = vmax.f32 %v1085_v62, 0.0 }
0x1557   :  { %1097 = vrot.lane.b32.xlu0 %v1086_v63, %s1435_s5 }
0x15c9   :  { %v1098_v0 = vpop.permute.xlu0 %1097 }
0x15ca   :  { %1324 = vmatmul.mubr.msk.f32.vlgmr.msra.gmra.mxu1 %vm256_vm5, %v1098_v0 }
0x168a   :  { %v1167_v2 = vpop.f32.mrf.mxu1 }
0x168b   :  { %v1168_v3 = vadd.f32 %v1208_v1, %v1167_v2 }
0x168c   :  { %v1325_v7 = vpop.f32.mrf.mxu1 }
0x168d   :  { %v1210_v5 = vmul.f32 -1.442695, %v1168_v3 }
0x168f   :  { %1381 = vpow2.f32 %v1210_v5 }
0x169c   :  { %v1382_v8 = vpop.eup %1381 }
0x169d   :  { %v1174_v9 = vadd.f32 1.0, %v1382_v8 }
0x169f   :  { %1383 = vrcp.f32 %v1174_v9 }
0x16ac   :  { %v1384_v10 = vpop.eup %1383 }
0x16ad   :  { %1178 = vst.msk [vmem:[%s1651_s9] sm:$0x3] %vm1177_vm6, %v1384_v10 }
0x16ae   :  { %1183 = vsyncpa [#allocation5], 1 }
0x16af   :  { %1184 = vsyncpa [#allocation7], 1 }

</bundles_post_ra>
